<compile_context>
chip_gen: v7x
topology: tpu7x:2x2x1
jax: 0.10.0
libtpu: 0.0.40
codegen_flags: <defaults>
</compile_context>

<pallas_src>
import jax
import jax.numpy as jnp
from jax.experimental import pallas as pl
from jax.experimental.pallas import tpu as pltpu


def prompt_clip_filter_kernel(v_ref, w_ref, b_ref, t_ref, pred_ref):
    # v_ref:    (TM, D)    f32       visual features (TM samples)
    # w_ref:    (D, D)     bf16      after_linear weight, stored (in, out)
    # b_ref:    (1, D)     f32       after_linear bias
    # t_ref:    (TM, N, D) f32/bf16  per-sample normalized text features (native layout)
    # pred_ref: (TM, N)    f32       softmax(100 * v_norm[m] @ t[m].T)
    tm = v_ref.shape[0]
    n = t_ref.shape[1]

    # after_linear: Linear(512,512) + ReLU   (bf16 inputs, f32 accumulation)
    h = jnp.dot(v_ref[...].astype(jnp.bfloat16), w_ref[...],
                preferred_element_type=jnp.float32)                    # (TM, D)
    h = jnp.maximum(h + b_ref[...], 0.0)

    # L2 normalize (eps guards all-zero ReLU rows and zero-padded batch rows)
    inv_norm = jax.lax.rsqrt(jnp.sum(h * h, axis=-1, keepdims=True) + 1e-12)
    h = (h * inv_norm).astype(jnp.bfloat16)                            # (TM, D) bf16

    # Per-sample similarity rows in ONE batched MXU contraction:
    #   sim[m, j] = sum_d h[m, d] * t[m, j, d]
    # Cast t to bf16 in-kernel (VPU filler, hides under the text DMA).
    t = t_ref[...].astype(jnp.bfloat16)                                # (TM, N, D)
    sim = jnp.einsum('bqd,bnd->bqn', h[:, None, :], t,
                     preferred_element_type=jnp.float32)               # (TM, 1, N)
    sim = 100.0 * sim.reshape(tm, n)                                   # (TM, N)

    # Row-wise softmax (max-subtraction keeps exp(100*x) in f32 range).
    sim = sim - jnp.max(sim, axis=-1, keepdims=True)
    e = jnp.exp(sim)
    denom = jnp.sum(e, axis=-1, keepdims=True)
    pred_ref[...] = e * pl.reciprocal(denom, approx=True)


def _round_up(x, m):
    return ((x + m - 1) // m) * m


def prompt_clip_filter(vfeats, w, b, text_features, *, tm_cap=None,
                       vmem_limit_bytes=None):
    """vfeats: (B, D) f32; w: (D, D) stored (in, out); b: (D,);
    text_features: (B, N, D), L2-normalized per row (CLIP encode_text outputs),
    consumed in its native layout/dtype (no wrapper-side cast/transpose pass).
    Returns (clip_pred (B, N), top5 values, top5 indices)."""
    B, D = vfeats.shape
    N = text_features.shape[1]
    t = text_features
    t_item = jnp.dtype(t.dtype).itemsize

    # ---- per-chip tile sizing (VMEM-budget driven) --------------------------
    try:
        phys_vmem = int(pltpu.get_tpu_info().vmem_capacity_bytes)
    except Exception:
        phys_vmem = 64 << 20            # v7x (smallest per-TC VMEM) as fallback

    # Per batch row: double-buffered text block + in-kernel bf16 cast temp.
    per_row = N * D * (2 * t_item + 2)
    if tm_cap is None:
        budget = phys_vmem // 2         # headroom for weight/out/pipelining/scratch
        tm_cap = max(8, min(128, (budget // per_row) // 8 * 8))

    if B > tm_cap:
        tm = tm_cap
    elif B >= 16:
        # Keep the grid >= 2 so both TensorCores are fed on 2-core chips (v7x).
        tm = min(tm_cap, max(8, _round_up(pl.cdiv(B, 2), 8)))
    else:
        tm = B

    b_pad = pl.cdiv(B, tm) * tm
    v = vfeats.astype(jnp.float32)
    if b_pad != B:
        pad = b_pad - B
        v = jnp.pad(v, ((0, pad), (0, 0)))
        t = jnp.pad(t, ((0, pad), (0, 0), (0, 0)))

    # after_linear weight is tiny (1 MiB) and resident across the grid: pre-cast once.
    w_bf = w.astype(jnp.bfloat16)
    b2 = b.reshape(1, D).astype(jnp.float32)

    if vmem_limit_bytes is None:
        needed = (tm * per_row                  # text double-buffer + bf16 cast temp
                  + 2 * D * D * 2               # weight (worst-case double-buffered)
                  + 2 * tm * D * 4              # visual-feature blocks
                  + 2 * tm * N * 4              # output blocks
                  + (4 << 20))                  # compiler scratch margin
        vmem_limit_bytes = int(min(max(needed, 32 << 20), phys_vmem - (8 << 20)))

    pred = pl.pallas_call(
        prompt_clip_filter_kernel,
        out_shape=jax.ShapeDtypeStruct((b_pad, N), jnp.float32),
        grid_spec=pltpu.PrefetchScalarGridSpec(
            num_scalar_prefetch=0,
            grid=(b_pad // tm,),
            in_specs=[
                pl.BlockSpec((tm, D), lambda i: (i, 0)),        # visual features
                pl.BlockSpec((D, D), lambda i: (0, 0)),          # after_linear W (bf16)
                pl.BlockSpec((1, D), lambda i: (0, 0)),          # after_linear bias
                pl.BlockSpec((tm, N, D), lambda i: (i, 0, 0)),   # text features
            ],
            out_specs=pl.BlockSpec((tm, N), lambda i: (i, 0)),
        ),
        compiler_params=pltpu.CompilerParams(
            dimension_semantics=("parallel",),
            vmem_limit_bytes=vmem_limit_bytes),
    )(v, w_bf, b2, t)

    clip_pred = pred[:B]
    # topk(5) concept prediction (outside the kernel, like the Python loop in torch)
    topk_vals, topk_ids = jax.lax.top_k(clip_pred, 5)
    return clip_pred, topk_vals, topk_ids


if __name__ == "__main__":
    B, D, N = 2, 512, 128  # batch, CLIP feature dim (module implies 512), concepts/pool

    key = jax.random.PRNGKey(0)
    k_v, k_w, k_b, k_t = jax.random.split(key, 4)

    # GLOBAL_FEATS visual features
    vfeats = jax.random.normal(k_v, (B, D), dtype=jnp.float32)

    # after_linear = nn.Linear(512, 512) — deterministic init, stored (in, out)
    w = jax.random.normal(k_w, (D, D), dtype=jnp.float32) * (1.0 / jnp.sqrt(D))
    b = jax.random.normal(k_b, (D,), dtype=jnp.float32) * 0.01

    # synthetic stand-in for normalized CLIP text features (per-sample concept pool)
    t = jax.random.normal(k_t, (B, N, D), dtype=jnp.float32)
    t = t / jnp.linalg.norm(t, axis=-1, keepdims=True)

    clip_pred, topk_vals, topk_ids = prompt_clip_filter(vfeats, w, b, t)
    jax.block_until_ready((clip_pred, topk_vals, topk_ids))

    # pure-JAX reference using the same bf16-input / f32-accumulate recipe
    h_ref = jnp.dot(vfeats.astype(jnp.bfloat16), w.astype(jnp.bfloat16),
                    preferred_element_type=jnp.float32) + b[None, :]
    h_ref = jnp.maximum(h_ref, 0.0)
    h_ref = h_ref / jnp.linalg.norm(h_ref, axis=-1, keepdims=True)
    sim_ref = 100.0 * jnp.einsum('bd,bnd->bn', h_ref.astype(jnp.bfloat16),
                                 t.astype(jnp.bfloat16),
                                 preferred_element_type=jnp.float32)
    ref = jax.nn.softmax(sim_ref, axis=-1)

    assert clip_pred.shape == (B, N) and topk_ids.shape == (B, 5)
    assert bool(jnp.all(jnp.isfinite(clip_pred))), "non-finite clip_pred"
    row_sums = jnp.sum(clip_pred, axis=-1)
    assert bool(jnp.all(jnp.abs(row_sums - 1.0) < 5e-3)), "softmax rows do not sum to 1"
    assert bool(jnp.max(jnp.abs(clip_pred - ref)) < 5e-3), "mismatch vs JAX reference"

    print("KERNEL_OK")
</pallas_src>

<mosaic_0001>
module attributes {stable_mosaic.version = 11 : i64} {
  func.func @prompt_clip_filter_kernel(%arg0: i32, %arg1: memref<2x512xf32, #tpu.memory_space<vmem>>, %arg2: memref<512x512xbf16, #tpu.memory_space<vmem>>, %arg3: memref<1x512xf32, #tpu.memory_space<vmem>>, %arg4: memref<2x128x512xf32, #tpu.memory_space<vmem>>, %arg5: memref<2x128xf32, #tpu.memory_space<vmem>>) attributes {dimension_semantics = [#tpu.dimension_semantics<parallel>], iteration_bounds = array<i64: 1>, scalar_prefetch = 0 : i64, scratch_operands = 0 : i64, tpu.core_type = #tpu.core_type<tc>, window_params = [{transform_indices = @transform_0, window_bounds = array<i64: 2, 512>}, {pipeline_mode = #tpu.pipeline_mode<synchronous>, transform_indices = @transform_1, window_bounds = array<i64: 512, 512>}, {pipeline_mode = #tpu.pipeline_mode<synchronous>, transform_indices = @transform_2, window_bounds = array<i64: 1, 512>}, {transform_indices = @transform_3, window_bounds = array<i64: 2, 128, 512>}, {transform_indices = @transform_4, window_bounds = array<i64: 2, 128>}]} {
    %c0 = arith.constant 0 : index
    %c0_0 = arith.constant 0 : index
    %0 = vector.load %arg1[%c0, %c0_0] : memref<2x512xf32, #tpu.memory_space<vmem>>, vector<2x512xf32>
    %1 = arith.truncf %0 : vector<2x512xf32> to vector<2x512xbf16>
    %c0_1 = arith.constant 0 : index
    %c0_2 = arith.constant 0 : index
    %2 = vector.load %arg2[%c0_1, %c0_2] : memref<512x512xbf16, #tpu.memory_space<vmem>>, vector<512x512xbf16>
    %cst = arith.constant dense<0.000000e+00> : vector<2x512xf32>
    %3 = tpu.matmul %1, %2, %cst {dimension_numbers = #tpu.dot_dimension_numbers<[1], [0], [0], [1], [0, 0, 1, 1], [], []>} : vector<2x512xbf16>, vector<512x512xbf16>, vector<2x512xf32> -> vector<2x512xf32>
    %c0_3 = arith.constant 0 : index
    %c0_4 = arith.constant 0 : index
    %4 = vector.load %arg3[%c0_3, %c0_4] : memref<1x512xf32, #tpu.memory_space<vmem>>, vector<1x512xf32>
    %5 = vector.broadcast %4 : vector<1x512xf32> to vector<2x512xf32>
    %6 = arith.addf %3, %5 : vector<2x512xf32>
    %cst_5 = arith.constant 0.000000e+00 : f32
    %7 = vector.broadcast %cst_5 : f32 to vector<2x512xf32>
    %8 = arith.maximumf %6, %7 : vector<2x512xf32>
    %9 = arith.mulf %8, %8 : vector<2x512xf32>
    %cst_6 = arith.constant dense<0.000000e+00> : vector<2xf32>
    %10 = vector.multi_reduction <add>, %9, %cst_6 [1] : vector<2x512xf32> to vector<2xf32>
    %11 = vector.shape_cast %10 : vector<2xf32> to vector<2x1xf32>
    %cst_7 = arith.constant 9.99999996E-13 : f32
    %12 = vector.broadcast %cst_7 : f32 to vector<2x1xf32>
    %13 = arith.addf %11, %12 : vector<2x1xf32>
    %14 = math.rsqrt %13 : vector<2x1xf32>
    %15 = vector.broadcast %14 : vector<2x1xf32> to vector<2x512xf32>
    %16 = arith.mulf %8, %15 : vector<2x512xf32>
    %17 = arith.truncf %16 : vector<2x512xf32> to vector<2x512xbf16>
    %c0_8 = arith.constant 0 : index
    %c0_9 = arith.constant 0 : index
    %c0_10 = arith.constant 0 : index
    %18 = vector.load %arg4[%c0_8, %c0_9, %c0_10] : memref<2x128x512xf32, #tpu.memory_space<vmem>>, vector<2x128x512xf32>
    %19 = arith.truncf %18 : vector<2x128x512xf32> to vector<2x128x512xbf16>
    %20 = vector.shape_cast %17 : vector<2x512xbf16> to vector<2x1x512xbf16>
    "tpu.trace_start"() <{level = 10 : i32, message = "bqd,bnd->bqn"}> : () -> ()
    %cst_11 = arith.constant dense<0.000000e+00> : vector<2x1x128xf32>
    %21 = tpu.matmul %20, %19, %cst_11 {dimension_numbers = #tpu.dot_dimension_numbers<[2], [2], [1], [1], [0, 0, 0, 1, 1, 1], [0], [0]>} : vector<2x1x512xbf16>, vector<2x128x512xbf16>, vector<2x1x128xf32> -> vector<2x1x128xf32>
    "tpu.trace_stop"() : () -> ()
    %22 = vector.shape_cast %21 : vector<2x1x128xf32> to vector<2x128xf32>
    %cst_12 = arith.constant 1.000000e+02 : f32
    %23 = vector.broadcast %cst_12 : f32 to vector<2x128xf32>
    %24 = arith.mulf %23, %22 : vector<2x128xf32>
    %cst_13 = arith.constant dense<0xFF800000> : vector<2xf32>
    %25 = vector.multi_reduction <maximumf>, %24, %cst_13 [1] : vector<2x128xf32> to vector<2xf32>
    %26 = vector.shape_cast %25 : vector<2xf32> to vector<2x1xf32>
    %27 = vector.broadcast %26 : vector<2x1xf32> to vector<2x128xf32>
    %28 = arith.subf %24, %27 : vector<2x128xf32>
    %29 = math.exp %28 : vector<2x128xf32>
    %cst_14 = arith.constant dense<0.000000e+00> : vector<2xf32>
    %30 = vector.multi_reduction <add>, %29, %cst_14 [1] : vector<2x128xf32> to vector<2xf32>
    %31 = vector.shape_cast %30 : vector<2xf32> to vector<2x1xf32>
    %32 = tpu.reciprocal %31 {approx = true} : vector<2x1xf32> -> vector<2x1xf32>
    %33 = vector.broadcast %32 : vector<2x1xf32> to vector<2x128xf32>
    %34 = arith.mulf %29, %33 : vector<2x128xf32>
    %c0_15 = arith.constant 0 : index
    %c0_16 = arith.constant 0 : index
    %35 = vector.load %arg5[%c0_15, %c0_16] : memref<2x128xf32, #tpu.memory_space<vmem>>, vector<2x128xf32>
    tpu.vector_store %arg5[%c0_15, %c0_16], %34 {strides = array<i32>} : memref<2x128xf32, #tpu.memory_space<vmem>>, vector<2x128xf32>,
    return
  }
  func.func @transform_0(%arg0: i32) -> (i32, i32) {
    %c0_i32 = arith.constant 0 : i32
    %c0_i32_0 = arith.constant 0 : i32
    return %arg0, %c0_i32 : i32, i32
  }
  func.func @transform_1(%arg0: i32) -> (i32, i32) {
    %c0_i32 = arith.constant 0 : i32
    %c0_i32_0 = arith.constant 0 : i32
    %c0_i32_1 = arith.constant 0 : i32
    return %c0_i32, %c0_i32_0 : i32, i32
  }
  func.func @transform_2(%arg0: i32) -> (i32, i32) {
    %c0_i32 = arith.constant 0 : i32
    %c0_i32_0 = arith.constant 0 : i32
    %c0_i32_1 = arith.constant 0 : i32
    return %c0_i32, %c0_i32_0 : i32, i32
  }
  func.func @transform_3(%arg0: i32) -> (i32, i32, i32) {
    %c0_i32 = arith.constant 0 : i32
    %c0_i32_0 = arith.constant 0 : i32
    %c0_i32_1 = arith.constant 0 : i32
    return %arg0, %c0_i32, %c0_i32_0 : i32, i32, i32
  }
  func.func @transform_4(%arg0: i32) -> (i32, i32) {
    %c0_i32 = arith.constant 0 : i32
    %c0_i32_0 = arith.constant 0 : i32
    return %arg0, %c0_i32 : i32, i32
  }
}

</mosaic_0001>

<bundles_post_ra>
// kernel: tpu_custom_call.1
= control target key start
LH: loop header
LB: loop body
LE: loop exit
PB: predicated region body
PF: predicated region fallthrough
CT: control target
= control target key end

     0   :  { %9 = vsyncpa [#allocation3], 0  ;;  %s2166_s0 = inlined_call_operand.hbm [shape: f32[2,512], index: 0, kind: input, shape index: {}]   ;;  %s2167_s1 = inlined_call_operand.hbm [shape: bf16[512,512], index: 1, kind: input, shape index: {}]   ;;  %s2168_s2 = inlined_call_operand.vmem [shape: f32[1,512], index: 2, kind: input, shape index: {}]   ;;  %s2169_s3 = inlined_call_operand.hbm [shape: f32[2,128,512], index: 3, kind: input, shape index: {}]   ;;  %s2170_s4 = inlined_call_operand.hbm [shape: f32[2,128], index: 4, kind: output, shape index: {}]  }
   0x1   :  { %10 = vsyncpa [#allocation6], 0 }
   0x2   :  { %11 = vsyncpa [#allocation4], 0  ;;  %s2005_s15 = smov [#allocation5]   ;;  %s1911_s19 = scalar_lea.hbm %s2167_s1, 16384 }
   0x3   :  { %s27_s16 = sshll.u32 %s2005_s15, 4  ;;  %p1912_p0 = scmp.ne.s32.totalorder %s2167_s1, %s1911_s19  ;;  %s28_s16 = int_to_ptr.vmem [resolvable:$true] %s27_s16 }
   0x4   :  { %p1915_p1 = scmp.lt.u32.totalorder %s1911_s19, %s2167_s1 }
   0x6   :  { %p1917_p2 = pnand %p1915_p1, %p1912_p0 }
   0x8   :  { %1920 = shalt.err (!%p1917_p2)
}
   0x9   :  { %s1921_s24 = scalar_lea.vmem %s28_s16, 16384  ;;  %p1926_p4 = scmp.lt.s32.totalorder %s28_s16, %s28_s16 }
   0xa   :  { %p1922_p3 = scmp.ne.s32.totalorder %s28_s16, %s1921_s24  ;;  %p1927_p5 = scmp.lt.s32.totalorder %s1921_s24, %s1921_s24 }
   0xc   :  { %p1928_p6 = por %p1927_p5, %p1926_p4 }
   0xe   :  { %p1929_p7 = pnand %p1928_p6, %p1922_p3 }
  0x10   :  { %1932 = shalt.err (!%p1929_p7)
}
  0x11   :  { %s2006_s25 = smov 256   ;;  %s2007_s26 = smov 16  }
  0x12   :  { %33 = dma.hbm_to_vmem [thread:$0]  %s2167_s1, 16384, %s28_s16, [#allocation6], %s2006_s25, %s2006_s25, %s2007_s26  }
  0x13   :  { %s2008_s29 = smov [#allocation2]   ;;  %s2009_s5 = smov [#allocation7]  }
  0x14   :  { %s18_s30 = sshll.u32 %s2008_s29, 4  ;;  %s41_s6 = sshll.u32 %s2009_s5, 4  ;;  %s19_s30 = int_to_ptr.vmem [resolvable:$true] %s18_s30  ;;  %s42_s6 = int_to_ptr.vmem [resolvable:$true] %s41_s6 }
  0x15   :  { %s1933_s9 = scalar_lea.hbm %s2166_s0, 128 }
  0x16   :  { %p1934_p8 = scmp.ne.s32.totalorder %s2166_s0, %s1933_s9  ;;  %p1937_p9 = scmp.lt.u32.totalorder %s1933_s9, %s2166_s0 }
  0x18   :  { %p1939_p10 = pnand %p1937_p9, %p1934_p8 }
  0x1a   :  { %1942 = shalt.err (!%p1939_p10)
}
  0x1b   :  { %s1943_s1 = scalar_lea.vmem %s19_s30, 128  ;;  %p1948_p12 = scmp.lt.s32.totalorder %s19_s30, %s19_s30 }
  0x1c   :  { %p1944_p11 = scmp.ne.s32.totalorder %s19_s30, %s1943_s1  ;;  %p1949_p13 = scmp.lt.s32.totalorder %s1943_s1, %s1943_s1 }
  0x1e   :  { %p1950_p0 = por %p1949_p13, %p1948_p12 }
  0x20   :  { %p1951_p1 = pnand %p1950_p0, %p1944_p11 }
  0x22   :  { %1954 = shalt.err (!%p1951_p1)
}
  0x23   :  { %21 = dma.hbm_to_vmem [thread:$0]  %s2166_s0, 128, %s19_s30, [#allocation3]  }
  0x24   :  { %s1955_s18 = scalar_lea.hbm %s2169_s3, 16384 }
  0x25   :  { %p1956_p2 = scmp.ne.s32.totalorder %s2169_s3, %s1955_s18  ;;  %p1959_p3 = scmp.lt.u32.totalorder %s1955_s18, %s2169_s3 }
  0x27   :  { %p1961_p4 = pnand %p1959_p3, %p1956_p2 }
  0x29   :  { %1964 = shalt.err (!%p1961_p4)
}
  0x2a   :  { %s1965_s23 = scalar_lea.vmem %s42_s6, 16384  ;;  %p1970_p6 = scmp.lt.s32.totalorder %s42_s6, %s42_s6 }
  0x2b   :  { %p1966_p5 = scmp.ne.s32.totalorder %s42_s6, %s1965_s23  ;;  %p1971_p7 = scmp.lt.s32.totalorder %s1965_s23, %s1965_s23 }
  0x2d   :  { %p1972_p8 = por %p1971_p7, %p1970_p6 }
  0x2f   :  { %p1973_p9 = pnand %p1972_p8, %p1966_p5 }
  0x31   :  { %1976 = shalt.err (!%p1973_p9)
}
  0x32   :  { %s2010_s0 = smov 512   ;;  %s2011_s24 = smov 32  }
  0x33   :  { %47 = dma.hbm_to_vmem [thread:$0]  %s2169_s3, 16384, %s42_s6, [#allocation6], %s2010_s0, %s2010_s0, %s2011_s24  }
  0x34   :  { %1999 = dma.done.wait [#allocation3], 128  }
  0x35   :  { %2000 = vsyncadd [#allocation3], 4294967168 }
  0x36   :  { %2001 = dma.done.wait [#allocation6], 32768  }
  0x37   :  { %2002 = vsyncadd [#allocation6], 4294934528  ;;  %v1710_v0 = vld [vmem:[#allocation5 + $0x4] ss:$16 sps:$4 sm:$0xff]   ;;  %v1712_v1 = vld [vmem:[#allocation5 + $0xc] ss:$16 sps:$4 sm:$0xff]   ;;  %v64_v38 = vlaneseq }
  0x38   :  { %875 = vmatprep.subr.bf16.mxu0 %v1710_v0  ;;  %v1714_v2 = vld [vmem:[#allocation5] ss:$16 sps:$4 sm:$0xff]   ;;  %v1715_v3 = vld [vmem:[#allocation5 + $0x8] ss:$16 sps:$4 sm:$0xff]   ;;  %957 = vmatprep.subr.bf16.mxu1 %v1712_v1  ;;  %v1716_v4 = vld [vmem:[#allocation5 + $0x24] ss:$16 sps:$4 sm:$0xff]  }
  0x39   :  { %876 = vmatpush1.bf16.msra.mxu0 %v1714_v2  ;;  %958 = vmatpush1.bf16.msra.mxu1 %v1715_v3  ;;  %v1718_v5 = vld [vmem:[#allocation5 + $0x2c] ss:$16 sps:$4 sm:$0xff]   ;;  %v1720_v6 = vld [vmem:[#allocation5 + $0x20] ss:$16 sps:$4 sm:$0xff]   ;;  %v1721_v7 = vld [vmem:[#allocation5 + $0x28] ss:$16 sps:$4 sm:$0xff]  }
  0x3a   :  { %877 = vmatprep.subr.bf16.mxu0 %v1716_v4  ;;  %959 = vmatprep.subr.bf16.mxu1 %v1718_v5  ;;  %v1722_v8 = vld [vmem:[#allocation5 + $0x44] ss:$16 sps:$4 sm:$0xff]   ;;  %v1724_v9 = vld [vmem:[#allocation5 + $0x4c] ss:$16 sps:$4 sm:$0xff]   ;;  %v1726_v10 = vld [vmem:[#allocation5 + $0x40] ss:$16 sps:$4 sm:$0xff]  }
  0x3b   :  { %v1727_v11 = vld [vmem:[#allocation5 + $0x48] ss:$16 sps:$4 sm:$0xff]   ;;  %v1728_v12 = vld [vmem:[#allocation5 + $0x64] ss:$16 sps:$4 sm:$0xff]   ;;  %v1730_v13 = vld [vmem:[#allocation5 + $0x6c] ss:$16 sps:$4 sm:$0xff]  }
  0x3c   :  { %v1732_v14 = vld [vmem:[#allocation5 + $0x60] ss:$16 sps:$4 sm:$0xff]   ;;  %v1733_v15 = vld [vmem:[#allocation5 + $0x68] ss:$16 sps:$4 sm:$0xff]   ;;  %v1734_v16 = vld [vmem:[#allocation5 + $0x84] ss:$16 sps:$4 sm:$0xff]  }
  0x3d   :  { %878 = vmatpush1.bf16.msra.mxu0 %v1720_v6  ;;  %960 = vmatpush1.bf16.msra.mxu1 %v1721_v7  ;;  %v1736_v17 = vld [vmem:[#allocation5 + $0x8c] ss:$16 sps:$4 sm:$0xff]   ;;  %v1738_v18 = vld [vmem:[#allocation5 + $0x80] ss:$16 sps:$4 sm:$0xff]   ;;  %v1739_v19 = vld [vmem:[#allocation5 + $0x88] ss:$16 sps:$4 sm:$0xff]  }
  0x3e   :  { %879 = vmatprep.subr.bf16.mxu0 %v1722_v8  ;;  %961 = vmatprep.subr.bf16.mxu1 %v1724_v9  ;;  %v1740_v20 = vld [vmem:[#allocation5 + $0xa4] ss:$16 sps:$4 sm:$0xff]   ;;  %v1742_v21 = vld [vmem:[#allocation5 + $0xac] ss:$16 sps:$4 sm:$0xff]   ;;  %v1744_v22 = vld [vmem:[#allocation5 + $0xa0] ss:$16 sps:$4 sm:$0xff]  }
  0x3f   :  { %v1745_v23 = vld [vmem:[#allocation5 + $0xa8] ss:$16 sps:$4 sm:$0xff]   ;;  %v1746_v24 = vld [vmem:[#allocation5 + $0xc4] ss:$16 sps:$4 sm:$0xff]   ;;  %v1748_v25 = vld [vmem:[#allocation5 + $0xcc] ss:$16 sps:$4 sm:$0xff]  }
  0x40   :  { %v1750_v26 = vld [vmem:[#allocation5 + $0xc0] ss:$16 sps:$4 sm:$0xff]   ;;  %v1751_v27 = vld [vmem:[#allocation5 + $0xc8] ss:$16 sps:$4 sm:$0xff]   ;;  %v1752_v28 = vld [vmem:[#allocation5 + $0xe4] ss:$16 sps:$4 sm:$0xff]  }
  0x41   :  { %880 = vmatpush1.bf16.msra.mxu0 %v1726_v10  ;;  %962 = vmatpush1.bf16.msra.mxu1 %v1727_v11  ;;  %v1754_v29 = vld [vmem:[#allocation5 + $0xec] ss:$16 sps:$4 sm:$0xff]   ;;  %v1756_v30 = vld [vmem:[#allocation5 + $0xe0] ss:$16 sps:$4 sm:$0xff]   ;;  %v1757_v31 = vld [vmem:[#allocation5 + $0xe8] ss:$16 sps:$4 sm:$0xff]  }
  0x42   :  { %881 = vmatprep.subr.bf16.mxu0 %v1728_v12  ;;  %963 = vmatprep.subr.bf16.mxu1 %v1730_v13  ;;  %v1758_v32 = vld [vmem:[#allocation5 + $0x104] ss:$16 sps:$4 sm:$0xff]   ;;  %v1760_v33 = vld [vmem:[#allocation5 + $0x10c] ss:$16 sps:$4 sm:$0xff]   ;;  %v1762_v34 = vld [vmem:[#allocation5 + $0x100] ss:$16 sps:$4 sm:$0xff]  }
  0x43   :  { %v1763_v35 = vld [vmem:[#allocation5 + $0x108] ss:$16 sps:$4 sm:$0xff]   ;;  %v2012_v36 = vmov 1983009808   ;;  %v1764_v39 = vld [vmem:[#allocation5 + $0x124] ss:$16 sps:$4 sm:$0xff]  }
  0x44   :  { %v62_v37 = vunpack.c.l.s4 %v2012_v36  ;;  %v1766_v40 = vld [vmem:[#allocation5 + $0x12c] ss:$16 sps:$4 sm:$0xff]   ;;  %v1768_v41 = vld [vmem:[#allocation5 + $0x120] ss:$16 sps:$4 sm:$0xff]   ;;  %v2076_v43 = vshrl.u32 %v64_v38, 7  ;;  %vm1047_vm0 = vcmask 1041408  }
  0x45   :  { %882 = vmatpush1.bf16.msra.mxu0 %v1732_v14  ;;  %964 = vmatpush1.bf16.msra.mxu1 %v1733_v15  ;;  %v1769_v44 = vld [vmem:[#allocation5 + $0x128] ss:$16 sps:$4 sm:$0xff]   ;;  %v1770_v45 = vld [vmem:[#allocation5 + $0x144] ss:$16 sps:$4 sm:$0xff]   ;;  %v1772_v46 = vld [vmem:[#allocation5 + $0x14c] ss:$16 sps:$4 sm:$0xff]  }
  0x46   :  { %883 = vmatprep.subr.bf16.mxu0 %v1734_v16  ;;  %965 = vmatprep.subr.bf16.mxu1 %v1736_v17  ;;  %v63_v42 = vunpack.c.0.s8 %v62_v37  ;;  %v1774_v47 = vld [vmem:[#allocation5 + $0x140] ss:$16 sps:$4 sm:$0xff]   ;;  %v1775_v48 = vld [vmem:[#allocation5 + $0x148] ss:$16 sps:$4 sm:$0xff]   ;;  %v1776_v50 = vld [vmem:[#allocation5 + $0x164] ss:$16 sps:$4 sm:$0xff]  }
  0x47   :  { %v1778_v51 = vld [vmem:[#allocation5 + $0x16c] ss:$16 sps:$4 sm:$0xff]   ;;  %v1780_v53 = vld [vmem:[#allocation5 + $0x160] ss:$16 sps:$4 sm:$0xff]   ;;  %v1781_v55 = vld [vmem:[#allocation5 + $0x168] ss:$16 sps:$4 sm:$0xff]  }
  0x48   :  { %v66_v49 = vsub.s32 %v63_v42, %v2076_v43  ;;  %v58_v52 = vld [vmem:[#allocation2] sm:$0xff]  ;;  %v1782_v56 = vld [vmem:[#allocation5 + $0x184] ss:$16 sps:$4 sm:$0xff]   ;;  %v1786_v59 = vld [vmem:[#allocation5 + $0x180] ss:$16 sps:$4 sm:$0xff]   ;;  %vm1496_vm1 = vcmask 1041409  }
  0x49   :  { %884 = vmatpush1.bf16.msra.mxu0 %v1738_v18  ;;  %966 = vmatpush1.bf16.msra.mxu1 %v1739_v19  ;;  %v1784_v57 = vld [vmem:[#allocation5 + $0x18c] ss:$16 sps:$4 sm:$0xff]   ;;  %v1787_v61 = vld [vmem:[#allocation5 + $0x188] ss:$16 sps:$4 sm:$0xff]   ;;  %v1788_v62 = vld [vmem:[#allocation5 + $0x1a4] ss:$16 sps:$4 sm:$0xff]   ;;  %v60_v4 = vcombine.high %v58_v52, %v58_v52 }
  0x4a   :  { %885 = vmatprep.subr.bf16.mxu0 %v1740_v20  ;;  %967 = vmatprep.subr.bf16.mxu1 %v1742_v21  ;;  %v67_v54 = vrot.slane %v58_v52, %v66_v49  ;;  %v1790_v63 = vld [vmem:[#allocation5 + $0x1ac] ss:$16 sps:$4 sm:$0xff]   ;;  %v1792_v0 = vld [vmem:[#allocation5 + $0x1a0] ss:$16 sps:$4 sm:$0xff]   ;;  %v1793_v1 = vld [vmem:[#allocation5 + $0x1a8] ss:$16 sps:$4 sm:$0xff]  }
  0x4b   :  { %v1794_v2 = vld [vmem:[#allocation5 + $0x1c4] ss:$16 sps:$4 sm:$0xff]   ;;  %v1796_v3 = vld [vmem:[#allocation5 + $0x1cc] ss:$16 sps:$4 sm:$0xff]   ;;  %v1798_v5 = vld [vmem:[#allocation5 + $0x1c0] ss:$16 sps:$4 sm:$0xff]   ;;  %v2079_v9 = vrot.slane %v60_v4, %v66_v49 }
  0x4c   :  { %v75_v58 = vcombine.high %v67_v54, %v67_v54  ;;  %v1799_v6 = vld [vmem:[#allocation5 + $0x1c8] ss:$16 sps:$4 sm:$0xff]   ;;  %v1800_v7 = vld [vmem:[#allocation5 + $0x1e4] ss:$16 sps:$4 sm:$0xff]   ;;  %v1802_v8 = vld [vmem:[#allocation5 + $0x1ec] ss:$16 sps:$4 sm:$0xff]   ;;  %v81_v16 = vpack.c.bf16 %v67_v54, %v67_v54 }
  0x4d   :  { %886 = vmatpush1.bf16.msra.mxu0 %v1744_v22  ;;  %968 = vmatpush1.bf16.msra.mxu1 %v1745_v23  ;;  %v1804_v10 = vld [vmem:[#allocation5 + $0x1e0] ss:$16 sps:$4 sm:$0xff]   ;;  %v1805_v11 = vld [vmem:[#allocation5 + $0x1e8] ss:$16 sps:$4 sm:$0xff]   ;;  %v1809_v12 = vld [vmem:[#allocation5 + $0x204] ss:$16 sps:$4 sm:$0xff]   ;;  %v76_v14 = vcombine.high %v2079_v9, %v2079_v9 }
  0x4e   :  { %887 = vmatprep.subr.bf16.mxu0 %v1746_v24  ;;  %969 = vmatprep.subr.bf16.mxu1 %v1748_v25  ;;  %v82_v60 = vpack.c.bf16 %v75_v58, %v75_v58  ;;  %v1812_v13 = vld [vmem:[#allocation5 + $0x20c] ss:$16 sps:$4 sm:$0xff]   ;;  %v1807_v15 = vld [vmem:[#allocation5 + $0x200] ss:$16 sps:$4 sm:$0xff]   ;;  %v1810_v17 = vld [vmem:[#allocation5 + $0x208] ss:$16 sps:$4 sm:$0xff]  }
  0x4f   :  { %v1815_v18 = vld [vmem:[#allocation5 + $0x224] ss:$16 sps:$4 sm:$0xff]   ;;  %v1818_v19 = vld [vmem:[#allocation5 + $0x22c] ss:$16 sps:$4 sm:$0xff]   ;;  %v84_v20 = vpack.c.bf16 %v76_v14, %v76_v14  ;;  %v1813_v21 = vld [vmem:[#allocation5 + $0x220] ss:$16 sps:$4 sm:$0xff]  }
  0x50   :  { %907 = vmatprep.mubr.bf16.mxu0 %v82_v60  ;;  %989 = vmatprep.mubr.bf16.mxu1 %v82_v60  ;;  %v1816_v22 = vld [vmem:[#allocation5 + $0x228] ss:$16 sps:$4 sm:$0xff]   ;;  %v1821_v23 = vld [vmem:[#allocation5 + $0x244] ss:$16 sps:$4 sm:$0xff]   ;;  %v1824_v24 = vld [vmem:[#allocation5 + $0x24c] ss:$16 sps:$4 sm:$0xff]  }
  0x51   :  { %888 = vmatpush1.bf16.msra.mxu0 %v1750_v26  ;;  %970 = vmatpush1.bf16.msra.mxu1 %v1751_v27  ;;  %v1819_v25 = vld [vmem:[#allocation5 + $0x240] ss:$16 sps:$4 sm:$0xff]   ;;  %v1822_v26 = vld [vmem:[#allocation5 + $0x248] ss:$16 sps:$4 sm:$0xff]   ;;  %v1827_v27 = vld [vmem:[#allocation5 + $0x264] ss:$16 sps:$4 sm:$0xff]  }
  0x52   :  { %889 = vmatprep.subr.bf16.mxu0 %v1752_v28  ;;  %971 = vmatprep.subr.bf16.mxu1 %v1754_v29  ;;  %v1830_v28 = vld [vmem:[#allocation5 + $0x26c] ss:$16 sps:$4 sm:$0xff]   ;;  %v1825_v29 = vld [vmem:[#allocation5 + $0x260] ss:$16 sps:$4 sm:$0xff]   ;;  %v1840_v38 = vld [vmem:[#allocation5 + $0x2a8] ss:$16 sps:$4 sm:$0xff]  }
  0x53   :  { %v1842_v36 = vld [vmem:[#allocation5 + $0x2ac] ss:$16 sps:$4 sm:$0xff]   ;;  %v1837_v37 = vld [vmem:[#allocation5 + $0x2a0] ss:$16 sps:$4 sm:$0xff]   ;;  %v1846_v42 = vld [vmem:[#allocation5 + $0x2c8] ss:$16 sps:$4 sm:$0xff]  }
  0x54   :  { %v1860_v49 = vld [vmem:[#allocation5 + $0x30c] ss:$16 sps:$4 sm:$0xff]   ;;  %v1863_v52 = vld [vmem:[#allocation5 + $0x324] ss:$16 sps:$4 sm:$0xff]   ;;  %v1861_v54 = vld [vmem:[#allocation5 + $0x320] ss:$16 sps:$4 sm:$0xff]  }
  0x55   :  { %890 = vmatpush1.bf16.msra.mxu0 %v1756_v30  ;;  %972 = vmatpush1.bf16.msra.mxu1 %v1757_v31  ;;  %v1828_v30 = vld [vmem:[#allocation5 + $0x268] ss:$16 sps:$4 sm:$0xff]   ;;  %v1833_v31 = vld [vmem:[#allocation5 + $0x284] ss:$16 sps:$4 sm:$0xff]   ;;  %v1867_v58 = vld [vmem:[#allocation5 + $0x340] ss:$16 sps:$4 sm:$0xff]  }
  0x56   :  { %891 = vmatprep.subr.bf16.mxu0 %v1758_v32  ;;  %973 = vmatprep.subr.bf16.mxu1 %v1760_v33  ;;  %v1836_v32 = vld [vmem:[#allocation5 + $0x28c] ss:$16 sps:$4 sm:$0xff]   ;;  %v1831_v33 = vld [vmem:[#allocation5 + $0x280] ss:$16 sps:$4 sm:$0xff]   ;;  %v1875_v60 = vld [vmem:[#allocation5 + $0x364] ss:$16 sps:$4 sm:$0xff]  }
  0x57   :  { %v1887_v4 = vld [vmem:[#allocation5 + $0x3a4] ss:$16 sps:$4 sm:$0xff]   ;;  %v1902_v14 = vld [vmem:[#allocation5 + $0x3ec] ss:$16 sps:$4 sm:$0xff]  }
  0x59   :  { %892 = vmatpush1.bf16.msra.mxu0 %v1762_v34  ;;  %974 = vmatpush1.bf16.msra.mxu1 %v1763_v35  ;;  %v1834_v34 = vld [vmem:[#allocation5 + $0x288] ss:$16 sps:$4 sm:$0xff]   ;;  %v1839_v35 = vld [vmem:[#allocation5 + $0x2a4] ss:$16 sps:$4 sm:$0xff]  }
  0x5a   :  { %893 = vmatprep.subr.bf16.mxu0 %v1764_v39  ;;  %975 = vmatprep.subr.bf16.mxu1 %v1766_v40  ;;  %v1845_v39 = vld [vmem:[#allocation5 + $0x2c4] ss:$16 sps:$4 sm:$0xff]   ;;  %v1848_v40 = vld [vmem:[#allocation5 + $0x2cc] ss:$16 sps:$4 sm:$0xff]  }
  0x5d   :  { %894 = vmatpush1.bf16.msra.mxu0 %v1768_v41  ;;  %976 = vmatpush1.bf16.msra.mxu1 %v1769_v44  ;;  %v1843_v41 = vld [vmem:[#allocation5 + $0x2c0] ss:$16 sps:$4 sm:$0xff]   ;;  %v1851_v44 = vld [vmem:[#allocation5 + $0x2e4] ss:$16 sps:$4 sm:$0xff]  }
  0x5e   :  { %895 = vmatprep.subr.bf16.mxu0 %v1770_v45  ;;  %977 = vmatprep.subr.bf16.mxu1 %v1772_v46  ;;  %v1854_v45 = vld [vmem:[#allocation5 + $0x2ec] ss:$16 sps:$4 sm:$0xff]   ;;  %v1849_v46 = vld [vmem:[#allocation5 + $0x2e0] ss:$16 sps:$4 sm:$0xff]  }
  0x61   :  { %896 = vmatpush1.bf16.msra.mxu0 %v1774_v47  ;;  %978 = vmatpush1.bf16.msra.mxu1 %v1775_v48  ;;  %v1852_v47 = vld [vmem:[#allocation5 + $0x2e8] ss:$16 sps:$4 sm:$0xff]   ;;  %v1857_v48 = vld [vmem:[#allocation5 + $0x304] ss:$16 sps:$4 sm:$0xff]  }
  0x62   :  { %897 = vmatprep.subr.bf16.mxu0 %v1776_v50  ;;  %979 = vmatprep.subr.bf16.mxu1 %v1778_v51  ;;  %v1855_v50 = vld [vmem:[#allocation5 + $0x300] ss:$16 sps:$4 sm:$0xff]   ;;  %v1858_v51 = vld [vmem:[#allocation5 + $0x308] ss:$16 sps:$4 sm:$0xff]  }
  0x65   :  { %898 = vmatpush1.bf16.msra.mxu0 %v1780_v53  ;;  %980 = vmatpush1.bf16.msra.mxu1 %v1781_v55  ;;  %v1866_v53 = vld [vmem:[#allocation5 + $0x32c] ss:$16 sps:$4 sm:$0xff]   ;;  %v1864_v55 = vld [vmem:[#allocation5 + $0x328] ss:$16 sps:$4 sm:$0xff]  }
  0x66   :  { %899 = vmatprep.subr.bf16.mxu0 %v1782_v56  ;;  %981 = vmatprep.subr.bf16.mxu1 %v1784_v57  ;;  %v1869_v56 = vld [vmem:[#allocation5 + $0x344] ss:$16 sps:$4 sm:$0xff]   ;;  %v1872_v57 = vld [vmem:[#allocation5 + $0x34c] ss:$16 sps:$4 sm:$0xff]  }
  0x69   :  { %900 = vmatpush1.bf16.msra.mxu0 %v1786_v59  ;;  %982 = vmatpush1.bf16.msra.mxu1 %v1787_v61  ;;  %v1870_v59 = vld [vmem:[#allocation5 + $0x348] ss:$16 sps:$4 sm:$0xff]   ;;  %v1878_v61 = vld [vmem:[#allocation5 + $0x36c] ss:$16 sps:$4 sm:$0xff]  }
  0x6a   :  { %901 = vmatprep.subr.bf16.mxu0 %v1788_v62  ;;  %983 = vmatprep.subr.bf16.mxu1 %v1790_v63  ;;  %v1873_v62 = vld [vmem:[#allocation5 + $0x360] ss:$16 sps:$4 sm:$0xff]   ;;  %v1876_v63 = vld [vmem:[#allocation5 + $0x368] ss:$16 sps:$4 sm:$0xff]  }
  0x6d   :  { %902 = vmatpush1.bf16.msra.mxu0 %v1792_v0  ;;  %984 = vmatpush1.bf16.msra.mxu1 %v1793_v1  ;;  %v1881_v0 = vld [vmem:[#allocation5 + $0x384] ss:$16 sps:$4 sm:$0xff]   ;;  %v1884_v1 = vld [vmem:[#allocation5 + $0x38c] ss:$16 sps:$4 sm:$0xff]  }
  0x6e   :  { %903 = vmatprep.subr.bf16.mxu0 %v1794_v2  ;;  %985 = vmatprep.subr.bf16.mxu1 %v1796_v3  ;;  %v1879_v2 = vld [vmem:[#allocation5 + $0x380] ss:$16 sps:$4 sm:$0xff]   ;;  %v1882_v3 = vld [vmem:[#allocation5 + $0x388] ss:$16 sps:$4 sm:$0xff]  }
  0x71   :  { %904 = vmatpush1.bf16.msra.mxu0 %v1798_v5  ;;  %986 = vmatpush1.bf16.msra.mxu1 %v1799_v6  ;;  %v1890_v5 = vld [vmem:[#allocation5 + $0x3ac] ss:$16 sps:$4 sm:$0xff]   ;;  %v1885_v6 = vld [vmem:[#allocation5 + $0x3a0] ss:$16 sps:$4 sm:$0xff]  }
  0x72   :  { %905 = vmatprep.subr.bf16.mxu0 %v1800_v7  ;;  %987 = vmatprep.subr.bf16.mxu1 %v1802_v8  ;;  %v1888_v7 = vld [vmem:[#allocation5 + $0x3a8] ss:$16 sps:$4 sm:$0xff]   ;;  %v1893_v8 = vld [vmem:[#allocation5 + $0x3c4] ss:$16 sps:$4 sm:$0xff]  }
  0x75   :  { %906 = vmatpush1.bf16.msra.mxu0 %v1804_v10  ;;  %988 = vmatpush1.bf16.msra.mxu1 %v1805_v11  ;;  %v1896_v10 = vld [vmem:[#allocation5 + $0x3cc] ss:$16 sps:$4 sm:$0xff]   ;;  %v1891_v11 = vld [vmem:[#allocation5 + $0x3c0] ss:$16 sps:$4 sm:$0xff]  }
  0x76   :  { %916 = vmatprep.subr.bf16.mxu0 %v1809_v12  ;;  %998 = vmatprep.subr.bf16.mxu1 %v1812_v13  ;;  %v1894_v12 = vld [vmem:[#allocation5 + $0x3c8] ss:$16 sps:$4 sm:$0xff]   ;;  %v1899_v13 = vld [vmem:[#allocation5 + $0x3e4] ss:$16 sps:$4 sm:$0xff]  }
  0x78   :  { %908 = vmatmul.mubr.bf16.vlgmr.msra.gmra.mrb[0].mxu0 %v81_v16  ;;  %990 = vmatmul.mubr.bf16.vlgmr.msra.gmra.mrb[0].mxu1 %v81_v16  ;;  %v1900_v16 = vld [vmem:[#allocation5 + $0x3e8] ss:$16 sps:$4 sm:$0xff]  }
  0x79   :  { %917 = vmatpush1.bf16.msra.mxu0 %v1807_v15  ;;  %999 = vmatpush1.bf16.msra.mxu1 %v1810_v17  ;;  %v1897_v15 = vld [vmem:[#allocation5 + $0x3e0] ss:$16 sps:$4 sm:$0xff]   ;;  %v83_v17 = vpack.c.bf16 %v2079_v9, %v2079_v9 }
  0x7a   :  { %918 = vmatprep.subr.bf16.mxu0 %v1815_v18  ;;  %1000 = vmatprep.subr.bf16.mxu1 %v1818_v19  ;;  %v1068_v18 = vld [vmem:[#allocation7 + $0x8] sm:$0xff] }
  0x7b   :  { %948 = vmatprep.mubr.bf16.mxu0 %v84_v20  ;;  %1030 = vmatprep.mubr.bf16.mxu1 %v84_v20  ;;  %v1072_v19 = vld [vmem:[#allocation7 + $0x28] sm:$0xff]  ;;  %v1067_v20 = vld [vmem:[#allocation7] sm:$0xff] }
  0x7d   :  { %919 = vmatpush1.bf16.msra.mxu0 %v1813_v21  ;;  %1001 = vmatpush1.bf16.msra.mxu1 %v1816_v22  ;;  %v1196_v21 = vpack.c.bf16 %v1072_v19, %v1068_v18  ;;  %v1071_v22 = vld [vmem:[#allocation7 + $0x20] sm:$0xff]  ;;  %v2095_v18 = vsub.s32 1, %v2076_v43  ;;  %v2098_v19 = vsub.s32 3, %v2076_v43 }
  0x7e   :  { %920 = vmatprep.subr.bf16.mxu0 %v1821_v23  ;;  %1002 = vmatprep.subr.bf16.mxu1 %v1824_v24  ;;  %v1132_v23 = vld [vmem:[#allocation7 + $0x208] sm:$0xff] }
  0x7f   :  { %v1136_v24 = vld [vmem:[#allocation7 + $0x228] sm:$0xff] }
  0x81   :  { %921 = vmatpush1.bf16.msra.mxu0 %v1819_v25  ;;  %1003 = vmatpush1.bf16.msra.mxu1 %v1822_v26  ;;  %v1195_v25 = vpack.c.bf16 %v1071_v22, %v1067_v20  ;;  %v1228_v26 = vpack.c.bf16 %v1136_v24, %v1132_v23 }
  0x82   :  { %922 = vmatprep.subr.bf16.mxu0 %v1827_v27  ;;  %1004 = vmatprep.subr.bf16.mxu1 %v1830_v28  ;;  %v1131_v27 = vld [vmem:[#allocation7 + $0x200] sm:$0xff] }
  0x83   :  { %v1135_v28 = vld [vmem:[#allocation7 + $0x220] sm:$0xff] }
  0x85   :  { %923 = vmatpush1.bf16.msra.mxu0 %v1825_v29  ;;  %1005 = vmatpush1.bf16.msra.mxu1 %v1828_v30  ;;  %v1076_v29 = vld [vmem:[#allocation7 + $0x48] sm:$0xff]  ;;  %v1227_v30 = vpack.c.bf16 %v1135_v28, %v1131_v27 }
  0x86   :  { %924 = vmatprep.subr.bf16.mxu0 %v1833_v31  ;;  %1006 = vmatprep.subr.bf16.mxu1 %v1836_v32  ;;  %v1080_v31 = vld [vmem:[#allocation7 + $0x68] sm:$0xff] }
  0x87   :  { %v1200_v9 = vpack.c.bf16 %v1080_v31, %v1076_v29  ;;  %v1140_v32 = vld [vmem:[#allocation7 + $0x248] sm:$0xff] }
  0x89   :  { %925 = vmatpush1.bf16.msra.mxu0 %v1831_v33  ;;  %1007 = vmatpush1.bf16.msra.mxu1 %v1834_v34  ;;  %v1144_v33 = vld [vmem:[#allocation7 + $0x268] sm:$0xff]  ;;  %v1075_v34 = vld [vmem:[#allocation7 + $0x40] sm:$0xff] }
  0x8a   :  { %926 = vmatprep.subr.bf16.mxu0 %v1839_v35  ;;  %1008 = vmatprep.subr.bf16.mxu1 %v1842_v36  ;;  %v1079_v35 = vld [vmem:[#allocation7 + $0x60] sm:$0xff]  ;;  %v1232_v36 = vpack.c.bf16 %v1144_v33, %v1140_v32 }
  0x8d   :  { %927 = vmatpush1.bf16.msra.mxu0 %v1837_v37  ;;  %1009 = vmatpush1.bf16.msra.mxu1 %v1840_v38  ;;  %v1139_v37 = vld [vmem:[#allocation7 + $0x240] sm:$0xff] }
  0x8e   :  { %928 = vmatprep.subr.bf16.mxu0 %v1845_v39  ;;  %1010 = vmatprep.subr.bf16.mxu1 %v1848_v40  ;;  %v1143_v38 = vld [vmem:[#allocation7 + $0x260] sm:$0xff]  ;;  %v1084_v39 = vld [vmem:[#allocation7 + $0x88] sm:$0xff] }
  0x8f   :  { %v1088_v40 = vld [vmem:[#allocation7 + $0xa8] sm:$0xff] }
  0x91   :  { %929 = vmatpush1.bf16.msra.mxu0 %v1843_v41  ;;  %1011 = vmatpush1.bf16.msra.mxu1 %v1846_v42  ;;  %v1148_v41 = vld [vmem:[#allocation7 + $0x288] sm:$0xff] }
  0x92   :  { %930 = vmatprep.subr.bf16.mxu0 %v1851_v44  ;;  %1012 = vmatprep.subr.bf16.mxu1 %v1854_v45  ;;  %v1152_v42 = vld [vmem:[#allocation7 + $0x2a8] sm:$0xff]  ;;  %v1199_v44 = vpack.c.bf16 %v1079_v35, %v1075_v34  ;;  %v1231_v45 = vpack.c.bf16 %v1143_v38, %v1139_v37 }
  0x95   :  { %931 = vmatpush1.bf16.msra.mxu0 %v1849_v46  ;;  %1013 = vmatpush1.bf16.msra.mxu1 %v1852_v47  ;;  %v1204_v46 = vpack.c.bf16 %v1088_v40, %v1084_v39  ;;  %v1236_v47 = vpack.c.bf16 %v1152_v42, %v1148_v41 }
  0x96   :  { %932 = vmatprep.subr.bf16.mxu0 %v1857_v48  ;;  %1014 = vmatprep.subr.bf16.mxu1 %v1860_v49  ;;  %v1083_v48 = vld [vmem:[#allocation7 + $0x80] sm:$0xff] }
  0x97   :  { %v1087_v49 = vld [vmem:[#allocation7 + $0xa0] sm:$0xff] }
  0x99   :  { %933 = vmatpush1.bf16.msra.mxu0 %v1855_v50  ;;  %1015 = vmatpush1.bf16.msra.mxu1 %v1858_v51  ;;  %v1147_v50 = vld [vmem:[#allocation7 + $0x280] sm:$0xff] }
  0x9a   :  { %934 = vmatprep.subr.bf16.mxu0 %v1863_v52  ;;  %1016 = vmatprep.subr.bf16.mxu1 %v1866_v53  ;;  %v1151_v51 = vld [vmem:[#allocation7 + $0x2a0] sm:$0xff]  ;;  %v1092_v52 = vld [vmem:[#allocation7 + $0xc8] sm:$0xff] }
  0x9b   :  { %v1096_v53 = vld [vmem:[#allocation7 + $0xe8] sm:$0xff] }
  0x9d   :  { %935 = vmatpush1.bf16.msra.mxu0 %v1861_v54  ;;  %1017 = vmatpush1.bf16.msra.mxu1 %v1864_v55  ;;  %v1156_v54 = vld [vmem:[#allocation7 + $0x2c8] sm:$0xff] }
  0x9e   :  { %936 = vmatprep.subr.bf16.mxu0 %v1869_v56  ;;  %1018 = vmatprep.subr.bf16.mxu1 %v1872_v57  ;;  %v1160_v55 = vld [vmem:[#allocation7 + $0x2e8] sm:$0xff]  ;;  %v1203_v56 = vpack.c.bf16 %v1087_v49, %v1083_v48  ;;  %v1235_v57 = vpack.c.bf16 %v1151_v51, %v1147_v50 }
  0x9f   :  { %v1108_v51 = vld [vmem:[#allocation7 + $0x148] sm:$0xff] }
  0xa1   :  { %937 = vmatpush1.bf16.msra.mxu0 %v1867_v58  ;;  %1019 = vmatpush1.bf16.msra.mxu1 %v1870_v59  ;;  %v1208_v58 = vpack.c.bf16 %v1096_v53, %v1092_v52  ;;  %v1240_v59 = vpack.c.bf16 %v1160_v55, %v1156_v54  ;;  %v1112_v52 = vld [vmem:[#allocation7 + $0x168] sm:$0xff]  ;;  %v1107_v54 = vld [vmem:[#allocation7 + $0x140] sm:$0xff] }
  0xa2   :  { %938 = vmatprep.subr.bf16.mxu0 %v1875_v60  ;;  %1020 = vmatprep.subr.bf16.mxu1 %v1878_v61  ;;  %v1091_v60 = vld [vmem:[#allocation7 + $0xc0] sm:$0xff]  ;;  %v1216_v53 = vpack.c.bf16 %v1112_v52, %v1108_v51 }
  0xa3   :  { %v1095_v61 = vld [vmem:[#allocation7 + $0xe0] sm:$0xff] }
  0xa4   :  { %v1111_v55 = vld [vmem:[#allocation7 + $0x160] sm:$0xff] }
  0xa5   :  { %939 = vmatpush1.bf16.msra.mxu0 %v1873_v62  ;;  %1021 = vmatpush1.bf16.msra.mxu1 %v1876_v63  ;;  %v1155_v62 = vld [vmem:[#allocation7 + $0x2c0] sm:$0xff] }
  0xa6   :  { %940 = vmatprep.subr.bf16.mxu0 %v1881_v0  ;;  %1022 = vmatprep.subr.bf16.mxu1 %v1884_v1  ;;  %v1159_v63 = vld [vmem:[#allocation7 + $0x2e0] sm:$0xff]  ;;  %v1100_v0 = vld [vmem:[#allocation7 + $0x108] sm:$0xff] }
  0xa7   :  { %v1104_v1 = vld [vmem:[#allocation7 + $0x128] sm:$0xff] }
  0xa9   :  { %941 = vmatpush1.bf16.msra.mxu0 %v1879_v2  ;;  %1023 = vmatpush1.bf16.msra.mxu1 %v1882_v3  ;;  %v1164_v2 = vld [vmem:[#allocation7 + $0x308] sm:$0xff] }
  0xaa   :  { %942 = vmatprep.subr.bf16.mxu0 %v1887_v4  ;;  %1024 = vmatprep.subr.bf16.mxu1 %v1890_v5  ;;  %v1168_v3 = vld [vmem:[#allocation7 + $0x328] sm:$0xff]  ;;  %v1207_v4 = vpack.c.bf16 %v1095_v61, %v1091_v60  ;;  %v1239_v5 = vpack.c.bf16 %v1159_v63, %v1155_v62  ;;  %v1175_v61 = vld [vmem:[#allocation7 + $0x360] sm:$0xff] }
  0xab   :  { %v1116_v62 = vld [vmem:[#allocation7 + $0x188] sm:$0xff] }
  0xac   :  { %v1120_v63 = vld [vmem:[#allocation7 + $0x1a8] sm:$0xff] }
  0xad   :  { %943 = vmatpush1.bf16.msra.mxu0 %v1885_v6  ;;  %1025 = vmatpush1.bf16.msra.mxu1 %v1888_v7  ;;  %v1212_v6 = vpack.c.bf16 %v1104_v1, %v1100_v0  ;;  %v1244_v7 = vpack.c.bf16 %v1168_v3, %v1164_v2  ;;  %v1220_v1 = vpack.c.bf16 %v1120_v63, %v1116_v62  ;;  %v1180_v2 = vld [vmem:[#allocation7 + $0x388] sm:$0xff]  ;;  %v1115_v3 = vld [vmem:[#allocation7 + $0x180] sm:$0xff]  ;;  %v1142_v63 = vld [vmem:[#allocation7 + $0x258] sm:$0xff] }
  0xae   :  { %944 = vmatprep.subr.bf16.mxu0 %v1893_v8  ;;  %1026 = vmatprep.subr.bf16.mxu1 %v1896_v10  ;;  %v1099_v8 = vld [vmem:[#allocation7 + $0x100] sm:$0xff] }
  0xaf   :  { %v1103_v10 = vld [vmem:[#allocation7 + $0x120] sm:$0xff] }
  0xb1   :  { %945 = vmatpush1.bf16.msra.mxu0 %v1891_v11  ;;  %1027 = vmatpush1.bf16.msra.mxu1 %v1894_v12  ;;  %v1163_v11 = vld [vmem:[#allocation7 + $0x300] sm:$0xff] }
  0xb2   :  { %946 = vmatprep.subr.bf16.mxu0 %v1899_v13  ;;  %1028 = vmatprep.subr.bf16.mxu1 %v1902_v14  ;;  %v1167_v12 = vld [vmem:[#allocation7 + $0x320] sm:$0xff]  ;;  %v1211_v13 = vpack.c.bf16 %v1103_v10, %v1099_v8  ;;  %v1128_v8 = vld [vmem:[#allocation7 + $0x1e8] sm:$0xff] }
  0xb3   :  { %v1243_v14 = vpack.c.bf16 %v1167_v12, %v1163_v11  ;;  %v1179_v10 = vld [vmem:[#allocation7 + $0x380] sm:$0xff] }
  0xb4   :  { %v1183_v11 = vld [vmem:[#allocation7 + $0x3a0] sm:$0xff] }
  0xb5   :  { %947 = vmatpush1.bf16.msra.mxu0 %v1897_v15  ;;  %1029 = vmatpush1.bf16.msra.mxu1 %v1900_v16  ;;  %v2086_v15 = vsub.s32 0, %v2076_v43  ;;  %v2089_v16 = vsub.s32 2, %v2076_v43 }
  0xb6   :  { %1310 = vmatprep.subr.bf16.mxu0 %v1196_v21  ;;  %1411 = vmatprep.subr.bf16.mxu1 %v1228_v26 }
  0xb8   :  { %949 = vmatmul.mubr.bf16.vlgmr.msra.gmra.mrb[0].mxu0 %v83_v17  ;;  %1031 = vmatmul.mubr.bf16.vlgmr.msra.gmra.mrb[0].mxu1 %v83_v17  ;;  %v213_v17 = vld [vmem:[%s2168_s2] sm:$0xf]  ;;  %s2014_s2 = smov [#allocation8]  }
  0xb9   :  { %v218_v20 = vrot.slane %v213_v17, %v2086_v15  ;;  %v226_v21 = vrot.slane %v213_v17, %v2089_v16  ;;  %v222_v22 = vrot.slane %v213_v17, %v2095_v18  ;;  %v230_v23 = vrot.slane %v213_v17, %v2098_v19  ;;  %s1539_s28 = sshll.u32 %s2014_s2, 4  ;;  %s1540_s28 = int_to_ptr.vmem [resolvable:$true] %s1539_s28 }
  0xba   :  { %s1977_s29 = scalar_lea.vmem %s1540_s28, 32  ;;  %p1982_p11 = scmp.lt.s32.totalorder %s1540_s28, %s1540_s28 }
  0xbb   :  { %p1978_p10 = scmp.ne.s32.totalorder %s1540_s28, %s1977_s29  ;;  %p1983_p12 = scmp.lt.s32.totalorder %s1977_s29, %s1977_s29 }
  0xbd   :  { %p1984_p13 = por %p1983_p12, %p1982_p11 }
  0xbe   :  { %1311 = vmatpush1.bf16.xpose.msra.mxu0 %v1195_v25  ;;  %1412 = vmatpush1.bf16.xpose.msra.mxu1 %v1227_v30 }
  0xbf   :  { %1312 = vmatprep.subr.bf16.mxu0 %v1200_v9  ;;  %1413 = vmatprep.subr.bf16.mxu1 %v1232_v36  ;;  %p1985_p0 = pnand %p1984_p13, %p1978_p10 }
  0xc6   :  { %1313 = vmatpush1.bf16.xpose.msra.mxu0 %v1199_v44  ;;  %1414 = vmatpush1.bf16.xpose.msra.mxu1 %v1231_v45 }
  0xc7   :  { %1314 = vmatprep.subr.bf16.mxu0 %v1204_v46  ;;  %1415 = vmatprep.subr.bf16.mxu1 %v1236_v47 }
  0xce   :  { %1315 = vmatpush1.bf16.xpose.msra.mxu0 %v1203_v56  ;;  %1416 = vmatpush1.bf16.xpose.msra.mxu1 %v1235_v57  ;;  %v1215_v56 = vpack.c.bf16 %v1111_v55, %v1107_v54  ;;  %v1172_v57 = vld [vmem:[#allocation7 + $0x348] sm:$0xff]  ;;  %v1069_v55 = vld [vmem:[#allocation7 + $0x10] sm:$0xff] }
  0xcf   :  { %1316 = vmatprep.subr.bf16.mxu0 %v1208_v58  ;;  %1417 = vmatprep.subr.bf16.mxu1 %v1240_v59  ;;  %v1176_v58 = vld [vmem:[#allocation7 + $0x368] sm:$0xff]  ;;  %v1171_v59 = vld [vmem:[#allocation7 + $0x340] sm:$0xff] }
  0xd0   :  { %v1248_v60 = vpack.c.bf16 %v1176_v58, %v1172_v57  ;;  %v1247_v0 = vpack.c.bf16 %v1175_v61, %v1171_v59  ;;  %v1082_v59 = vld [vmem:[#allocation7 + $0x78] sm:$0xff]  ;;  %v1137_v61 = vld [vmem:[#allocation7 + $0x230] sm:$0xff] }
  0xd6   :  { %1317 = vmatpush1.bf16.xpose.msra.mxu0 %v1207_v4  ;;  %1418 = vmatpush1.bf16.xpose.msra.mxu1 %v1239_v5  ;;  %v1119_v4 = vld [vmem:[#allocation7 + $0x1a0] sm:$0xff]  ;;  %v1184_v5 = vld [vmem:[#allocation7 + $0x3a8] sm:$0xff] }
  0xd7   :  { %1318 = vmatprep.subr.bf16.mxu0 %v1212_v6  ;;  %1419 = vmatprep.subr.bf16.mxu1 %v1244_v7  ;;  %v1252_v6 = vpack.c.bf16 %v1184_v5, %v1180_v2  ;;  %v1124_v7 = vld [vmem:[#allocation7 + $0x1c8] sm:$0xff]  ;;  %v1219_v12 = vpack.c.bf16 %v1119_v4, %v1115_v3 }
  0xd8   :  { %v1224_v17 = vpack.c.bf16 %v1128_v8, %v1124_v7  ;;  %v1077_v7 = vld [vmem:[#allocation7 + $0x50] sm:$0xff] }
  0xd9   :  { %v1081_v8 = vld [vmem:[#allocation7 + $0x70] sm:$0xff] }
  0xde   :  { %1319 = vmatpush1.bf16.xpose.msra.mxu0 %v1211_v13  ;;  %1420 = vmatpush1.bf16.xpose.msra.mxu1 %v1243_v14  ;;  %v1188_v13 = vld [vmem:[#allocation7 + $0x3c8] sm:$0xff] }
  0xdf   :  { %1320 = vmatprep.subr.bf16.mxu0 %v1216_v53  ;;  %1421 = vmatprep.subr.bf16.mxu1 %v1248_v60  ;;  %v1192_v14 = vld [vmem:[#allocation7 + $0x3e8] sm:$0xff]  ;;  %v1133_v60 = vld [vmem:[#allocation7 + $0x210] sm:$0xff] }
  0xe0   :  { %v1229_v4 = vpack.c.bf16 %v1137_v61, %v1133_v60  ;;  %v1118_v60 = vld [vmem:[#allocation7 + $0x198] sm:$0xff] }
  0xe1   :  { %v1122_v61 = vld [vmem:[#allocation7 + $0x1b8] sm:$0xff] }
  0xe6   :  { %1321 = vmatpush1.bf16.xpose.msra.mxu0 %v1215_v56  ;;  %1422 = vmatpush1.bf16.xpose.msra.mxu1 %v1247_v0  ;;  %v1073_v56 = vld [vmem:[#allocation7 + $0x30] sm:$0xff]  ;;  %v1146_v0 = vld [vmem:[#allocation7 + $0x278] sm:$0xff] }
  0xe7   :  { %1322 = vmatprep.subr.bf16.mxu0 %v1220_v1  ;;  %1423 = vmatprep.subr.bf16.mxu1 %v1252_v6  ;;  %v1234_v5 = vpack.c.bf16 %v1146_v0, %v1142_v63  ;;  %v1173_v63 = vld [vmem:[#allocation7 + $0x350] sm:$0xff] }
  0xe8   :  { %v1177_v0 = vld [vmem:[#allocation7 + $0x370] sm:$0xff] }
  0xee   :  { %1323 = vmatpush1.bf16.xpose.msra.mxu0 %v1219_v12  ;;  %v1145_v12 = vld [vmem:[#allocation7 + $0x270] sm:$0xff] }
  0xef   :  { %1324 = vmatprep.subr.bf16.mxu0 %v1224_v17  ;;  %v1154_v17 = vld [vmem:[#allocation7 + $0x2b8] sm:$0xff] }
 0x18b   :  { %v950_v24 = vpop.f32.mrb[0].mxu0  ;;  %v1032_v25 = vpop.f32.mrb[0].mxu1 }
 0x18c   :  { %v1680_v26 = vadd.f32 %v950_v24, %v218_v20  ;;  %v1682_v27 = vadd.f32 %v1032_v25, %v226_v21  ;;  %v952_v28 = vpop.f32.mrb[1].mxu0  ;;  %v1034_v29 = vpop.f32.mrb[1].mxu1  ;;  %v1251_v20 = vpack.c.bf16 %v1183_v11, %v1179_v10  ;;  %v1256_v21 = vpack.c.bf16 %v1192_v14, %v1188_v13  ;;  %v1187_v24 = vld [vmem:[#allocation7 + $0x3c0] sm:$0xff]  ;;  %v1086_v10 = vld [vmem:[#allocation7 + $0x98] sm:$0xff] }
 0x18d   :  { %v1681_v30 = vadd.f32 %v952_v28, %v222_v22  ;;  %v1683_v31 = vadd.f32 %v1034_v29, %v230_v23  ;;  %v954_v9 = vpop.f32.mrb[2].mxu0  ;;  %v1036_v32 = vpop.f32.mrb[2].mxu1  ;;  %v1123_v22 = vld [vmem:[#allocation7 + $0x1c0] sm:$0xff]  ;;  %v1070_v28 = vld [vmem:[#allocation7 + $0x18] sm:$0xff] }
 0x18e   :  { %v2104_v33 = vmax.f32 %v1680_v26, 0.0  ;;  %v2106_v34 = vmax.f32 %v1682_v27, 0.0  ;;  %v955_v35 = vpop.f32.mrb[3].mxu0  ;;  %v1037_v36 = vpop.f32.mrb[3].mxu1  ;;  %v1127_v23 = vld [vmem:[#allocation7 + $0x1e0] sm:$0xff]  ;;  %1424 = vmatpush1.bf16.xpose.msra.mxu1 %v1251_v20  ;;  %v1074_v29 = vld [vmem:[#allocation7 + $0x38] sm:$0xff] }
 0x18f   :  { %v2108_v37 = vmax.f32 %v1681_v30, 0.0  ;;  %v2110_v38 = vmax.f32 %v1683_v31, 0.0  ;;  %1425 = vmatprep.subr.bf16.mxu1 %v1256_v21  ;;  %v1191_v25 = vld [vmem:[#allocation7 + $0x3e0] sm:$0xff]  ;;  %v1223_v26 = vpack.c.bf16 %v1127_v23, %v1123_v22  ;;  %v1198_v30 = vpack.c.bf16 %v1074_v29, %v1070_v28  ;;  %v1134_v31 = vld [vmem:[#allocation7 + $0x218] sm:$0xff]  ;;  %v1089_v22 = vld [vmem:[#allocation7 + $0xb0] sm:$0xff] }
 0x190   :  { %v1043_v39 = vmul.f32 %v2104_v33, %v2104_v33  ;;  %v1045_v40 = vmul.f32 %v2106_v34, %v2106_v34  ;;  %v1255_v27 = vpack.c.bf16 %v1191_v25, %v1187_v24  ;;  %v1138_v9 = vld [vmem:[#allocation7 + $0x238] sm:$0xff] }
 0x191   :  { %v1044_v41 = vmul.f32 %v2108_v37, %v2108_v37  ;;  %v1046_v44 = vmul.f32 %v2110_v38, %v2110_v38  ;;  %1325 = vmatpush1.bf16.xpose.msra.mxu0 %v1223_v26  ;;  %v1230_v32 = vpack.c.bf16 %v1138_v9, %v1134_v31  ;;  %v1090_v11 = vld [vmem:[#allocation7 + $0xb8] sm:$0xff]  ;;  %v1149_v26 = vld [vmem:[#allocation7 + $0x290] sm:$0xff] }
 0x192   :  { %v1048_v42 = vsel %vm1047_vm0, %v1043_v39, 0.0  ;;  %v1051_v47 = vsel %vm1047_vm0, %v1045_v40, 0.0  ;;  %1350 = vmatprep.subr.bf16.mxu0 %v1198_v30  ;;  %v2013_v39 = vmov 1966171168   ;;  %v1206_v13 = vpack.c.bf16 %v1090_v11, %v1086_v10  ;;  %v1150_v14 = vld [vmem:[#allocation7 + $0x298] sm:$0xff] }
 0x193   :  { %v1049_v45 = vsel %vm1047_vm0, %v1044_v41, 0.0  ;;  %v1053_v49 = vsel %vm1047_vm0, %v1046_v44, 0.0  ;;  %v1266_v40 = vunpack.c.l.s4 %v2013_v39  ;;  %v1238_v21 = vpack.c.bf16 %v1154_v17, %v1150_v14  ;;  %v1094_v23 = vld [vmem:[#allocation7 + $0xd8] sm:$0xff] }
 0x194   :  { %v1050_v46 = vadd.f32 %v1049_v45, %v1048_v42  ;;  %v1098_v24 = vld [vmem:[#allocation7 + $0xf8] sm:$0xff] }
 0x195   :  { %v1267_v41 = vunpack.c.0.s8 %v1266_v40  ;;  %v1210_v28 = vpack.c.bf16 %v1098_v24, %v1094_v23  ;;  %v1158_v29 = vld [vmem:[#allocation7 + $0x2d8] sm:$0xff]  ;;  %v1189_v23 = vld [vmem:[#allocation7 + $0x3d0] sm:$0xff] }
 0x196   :  { %v1052_v48 = vadd.f32 %v1051_v47, %v1050_v46  ;;  %1426 = vmatpush1.bf16.xpose.msra.mxu1 %v1255_v27  ;;  %v1153_v27 = vld [vmem:[#allocation7 + $0x2b0] sm:$0xff]  ;;  %v1162_v30 = vld [vmem:[#allocation7 + $0x2f8] sm:$0xff] }
 0x197   :  { %1451 = vmatprep.subr.bf16.mxu1 %v1230_v32  ;;  %v1270_v44 = vsub.s32 %v1267_v41, %v2076_v43  ;;  %v1078_v43 = vld [vmem:[#allocation7 + $0x58] sm:$0xff]  ;;  %v1237_v31 = vpack.c.bf16 %v1153_v27, %v1149_v26  ;;  %v1242_v9 = vpack.c.bf16 %v1162_v30, %v1158_v29  ;;  %v1093_v32 = vld [vmem:[#allocation7 + $0xd0] sm:$0xff] }
 0x198   :  { %v1054_v50 = vadd.f32 %v1053_v49, %v1052_v48  ;;  %v1202_v62 = vpack.c.bf16 %v1082_v59, %v1078_v43  ;;  %v1106_v39 = vld [vmem:[#allocation7 + $0x138] sm:$0xff]  ;;  %v1157_v41 = vld [vmem:[#allocation7 + $0x2d0] sm:$0xff] }
 0x199   :  { %v1178_v43 = vld [vmem:[#allocation7 + $0x378] sm:$0xff]  ;;  %v1193_v24 = vld [vmem:[#allocation7 + $0x3f0] sm:$0xff] }
 0x19a   :  { %1055 = vadd.xlane.f32.xlu0 %v1054_v50  ;;  %v1130_v10 = vld [vmem:[#allocation7 + $0x1f8] sm:$0xff] }
 0x19b   :  { %v1194_v14 = vld [vmem:[#allocation7 + $0x3f8] sm:$0xff] }
 0x227   :  { %v1056_v35 = vpop.xlane.xlu0 %1055 }
 0x228   :  { %v1057_v36 = vadd.f32 1e-12, %v1056_v35  ;;  %v1097_v35 = vld [vmem:[#allocation7 + $0xf0] sm:$0xff] }
 0x229   :  { %v1209_v40 = vpack.c.bf16 %v1097_v35, %v1093_v32 }
 0x22a   :  { %1903 = vrsqrt.f32 %v1057_v36  ;;  %v1102_v36 = vld [vmem:[#allocation7 + $0x118] sm:$0xff] }
 0x234   :  { %v1904_v42 = vpop.eup %1903 }
 0x235   :  { %v1059_v45 = vmul.f32 %v1904_v42, %v2104_v33  ;;  %v1060_v46 = vmul.f32 %v1904_v42, %v2108_v37  ;;  %v1061_v47 = vmul.f32 %v1904_v42, %v2106_v34  ;;  %v1062_v48 = vmul.f32 %v1904_v42, %v2110_v38  ;;  %v1161_v42 = vld [vmem:[#allocation7 + $0x2f0] sm:$0xff] }
 0x236   :  { %v1197_v37 = vpack.c.bf16 %v1073_v56, %v1069_v55  ;;  %v1169_v55 = vld [vmem:[#allocation7 + $0x330] sm:$0xff] }
 0x237   :  { %v1677_v49 = vpack.c.bf16 %v1060_v46, %v1059_v45  ;;  %v1678_v50 = vpack.c.bf16 %v1062_v48, %v1061_v47  ;;  %v1166_v45 = vld [vmem:[#allocation7 + $0x318] sm:$0xff]  ;;  %v1241_v47 = vpack.c.bf16 %v1161_v42, %v1157_v41 }
 0x238   :  { %v1170_v46 = vld [vmem:[#allocation7 + $0x338] sm:$0xff] }
 0x239   :  { %v1271_v51 = vrot.slane %v1677_v49, %v1270_v44  ;;  %v1278_v52 = vrot.slane %v1678_v50, %v1270_v44  ;;  %v1246_v48 = vpack.c.bf16 %v1170_v46, %v1166_v45  ;;  %v1101_v49 = vld [vmem:[#allocation7 + $0x110] sm:$0xff] }
 0x23a   :  { %v1105_v50 = vld [vmem:[#allocation7 + $0x130] sm:$0xff] }
 0x23b   :  { %v1279_v53 = vcombine.low %v1271_v51, %v1278_v52  ;;  %v1110_v51 = vld [vmem:[#allocation7 + $0x158] sm:$0xff] }
 0x23c   :  { %v1114_v52 = vld [vmem:[#allocation7 + $0x178] sm:$0xff] }
 0x23d   :  { %v1286_v54 = vrot.slane %v1279_v53, %v1270_v44  ;;  %v1214_v44 = vpack.c.bf16 %v1106_v39, %v1102_v36  ;;  %v1213_v53 = vpack.c.bf16 %v1105_v50, %v1101_v49  ;;  %v1218_v56 = vpack.c.bf16 %v1114_v52, %v1110_v51 }
 0x23f   :  { %v2129_v57 = vpack.i.b16 %v1286_v54, %v1286_v54  ;;  %v1288_v58 = vunpack.i.h.s16 %v1286_v54  ;;  %v1165_v54 = vld [vmem:[#allocation7 + $0x310] sm:$0xff] }
 0x240   :  { %v1245_v59 = vpack.c.bf16 %v1169_v55, %v1165_v54 }
 0x241   :  { %v1297_v33 = vrot.slane %v2129_v57, %v2095_v18  ;;  %v1293_v34 = vrot.slane %v2129_v57, %v2086_v15  ;;  %v2135_v38 = vpack.i.b16 %v1288_v58, %v1288_v58  ;;  %v1305_v1 = vrot.slane %v2129_v57, %v2098_v19  ;;  %v1174_v58 = vld [vmem:[#allocation7 + $0x358] sm:$0xff] }
 0x242   :  { %v1301_v26 = vrot.slane %v2129_v57, %v2089_v16 }
 0x243   :  { %1342 = vmatprep.mubr.bf16.mxu0 %v1297_v33  ;;  %v1398_v2 = vrot.slane %v2135_v38, %v2095_v18  ;;  %v1394_v3 = vrot.slane %v2135_v38, %v2086_v15  ;;  %v1406_v6 = vrot.slane %v2135_v38, %v2098_v19  ;;  %v1201_v18 = vpack.c.bf16 %v1081_v8, %v1077_v7  ;;  %v1141_v15 = vld [vmem:[#allocation7 + $0x250] sm:$0xff]  ;;  %v1126_v8 = vld [vmem:[#allocation7 + $0x1d8] sm:$0xff] }
 0x244   :  { %1343 = vmatmul.mubr.bf16.vlgmr.msra.gmra.mrb[4].mxu0 %v1293_v34  ;;  %v1233_v20 = vpack.c.bf16 %v1145_v12, %v1141_v15  ;;  %v1085_v19 = vld [vmem:[#allocation7 + $0x90] sm:$0xff]  ;;  %v1250_v33 = vpack.c.bf16 %v1178_v43, %v1174_v58  ;;  %v1226_v12 = vpack.c.bf16 %v1130_v10, %v1126_v8  ;;  %v1402_v27 = vrot.slane %v2135_v38, %v2089_v16 }
 0x245   :  { %1351 = vmatpush1.bf16.xpose.msra.mxu0 %v1197_v37  ;;  %1382 = vmatprep.mubr.bf16.mxu0 %v1305_v1  ;;  %v1205_v25 = vpack.c.bf16 %v1089_v22, %v1085_v19  ;;  %v1109_v34 = vld [vmem:[#allocation7 + $0x150] sm:$0xff]  ;;  %v1222_v1 = vpack.c.bf16 %v1122_v61, %v1118_v60 }
 0x246   :  { %1443 = vmatprep.mubr.bf16.mxu1 %v1398_v2  ;;  %1352 = vmatprep.subr.bf16.mxu0 %v1202_v62  ;;  %v1113_v37 = vld [vmem:[#allocation7 + $0x170] sm:$0xff]  ;;  %v1182_v2 = vld [vmem:[#allocation7 + $0x398] sm:$0xff] }
 0x247   :  { %1444 = vmatmul.mubr.bf16.vlgmr.msra.gmra.mrb[4].mxu1 %v1394_v3  ;;  %v1217_v62 = vpack.c.bf16 %v1113_v37, %v1109_v34  ;;  %v1186_v3 = vld [vmem:[#allocation7 + $0x3b8] sm:$0xff]  ;;  %v1121_v7 = vld [vmem:[#allocation7 + $0x1b0] sm:$0xff] }
 0x248   :  { %1452 = vmatpush1.bf16.xpose.msra.mxu1 %v1229_v4  ;;  %1483 = vmatprep.mubr.bf16.mxu1 %v1406_v6  ;;  %v1249_v4 = vpack.c.bf16 %v1177_v0, %v1173_v63  ;;  %v1117_v6 = vld [vmem:[#allocation7 + $0x190] sm:$0xff] }
 0x249   :  { %1453 = vmatprep.subr.bf16.mxu1 %v1234_v5  ;;  %v1254_v5 = vpack.c.bf16 %v1186_v3, %v1182_v2  ;;  %v1221_v11 = vpack.c.bf16 %v1121_v7, %v1117_v6  ;;  %v1185_v15 = vld [vmem:[#allocation7 + $0x3b0] sm:$0xff] }
 0x24a   :  { %v1129_v19 = vld [vmem:[#allocation7 + $0x1f0] sm:$0xff] }
 0x24d   :  { %1353 = vmatpush1.bf16.xpose.msra.mxu0 %v1201_v18  ;;  %v1181_v18 = vld [vmem:[#allocation7 + $0x390] sm:$0xff] }
 0x24e   :  { %1354 = vmatprep.subr.bf16.mxu0 %v1206_v13  ;;  %v1190_v13 = vld [vmem:[#allocation7 + $0x3d8] sm:$0xff]  ;;  %v1253_v17 = vpack.c.bf16 %v1185_v15, %v1181_v18 }
 0x250   :  { %1454 = vmatpush1.bf16.xpose.msra.mxu1 %v1233_v20  ;;  %v1258_v20 = vpack.c.bf16 %v1194_v14, %v1190_v13 }
 0x251   :  { %1455 = vmatprep.subr.bf16.mxu1 %v1238_v21  ;;  %v1125_v21 = vld [vmem:[#allocation7 + $0x1d0] sm:$0xff] }
 0x252   :  { %v1225_v22 = vpack.c.bf16 %v1129_v19, %v1125_v21 }
 0x255   :  { %1355 = vmatpush1.bf16.xpose.msra.mxu0 %v1205_v25  ;;  %v1257_v25 = vpack.c.bf16 %v1193_v24, %v1189_v23 }
 0x256   :  { %1356 = vmatprep.subr.bf16.mxu0 %v1210_v28 }
 0x258   :  { %1456 = vmatpush1.bf16.xpose.msra.mxu1 %v1237_v31 }
 0x259   :  { %1457 = vmatprep.subr.bf16.mxu1 %v1242_v9 }
 0x25d   :  { %1357 = vmatpush1.bf16.xpose.msra.mxu0 %v1209_v40 }
 0x25e   :  { %1358 = vmatprep.subr.bf16.mxu0 %v1214_v44 }
 0x260   :  { %1458 = vmatpush1.bf16.xpose.msra.mxu1 %v1241_v47 }
 0x261   :  { %1459 = vmatprep.subr.bf16.mxu1 %v1246_v48 }
 0x265   :  { %1359 = vmatpush1.bf16.xpose.msra.mxu0 %v1213_v53 }
 0x266   :  { %1360 = vmatprep.subr.bf16.mxu0 %v1218_v56 }
 0x268   :  { %1460 = vmatpush1.bf16.xpose.msra.mxu1 %v1245_v59 }
 0x269   :  { %1461 = vmatprep.subr.bf16.mxu1 %v1250_v33 }
 0x26d   :  { %1361 = vmatpush1.bf16.xpose.msra.mxu0 %v1217_v62 }
 0x26e   :  { %1362 = vmatprep.subr.bf16.mxu0 %v1222_v1 }
 0x270   :  { %1462 = vmatpush1.bf16.xpose.msra.mxu1 %v1249_v4 }
 0x271   :  { %1463 = vmatprep.subr.bf16.mxu1 %v1254_v5 }
 0x275   :  { %1363 = vmatpush1.bf16.xpose.msra.mxu0 %v1221_v11 }
 0x276   :  { %1364 = vmatprep.subr.bf16.mxu0 %v1226_v12 }
 0x278   :  { %1464 = vmatpush1.bf16.xpose.msra.mxu1 %v1253_v17 }
 0x279   :  { %1465 = vmatprep.subr.bf16.mxu1 %v1258_v20 }
 0x27d   :  { %1365 = vmatpush1.bf16.xpose.msra.mxu0 %v1225_v22 }
 0x280   :  { %1466 = vmatpush1.bf16.xpose.msra.mxu1 %v1257_v25 }
 0x284   :  { %1383 = vmatmul.mubr.bf16.vlgmr.msra.gmra.mrb[4].mxu0 %v1301_v26 }
 0x287   :  { %1484 = vmatmul.mubr.bf16.vlgmr.msra.gmra.mrb[4].mxu1 %v1402_v27 }
 0x357   :  { %v1384_v28 = vpop.f32.mrb[4].mxu0 }
 0x358   :  { %v1386_v29 = vpop.f32.mrb[5].mxu0  ;;  %v1491_v39 = vmul.f32 100.0, %v1384_v28 }
 0x359   :  { %v1387_v30 = vpop.f32.mrb[6].mxu0 }
 0x35a   :  { %v1485_v31 = vpop.f32.mrb[4].mxu1  ;;  %v1388_v9 = vpop.f32.mrb[7].mxu0 }
 0x35b   :  { %v1492_v32 = vmul.f32 100.0, %v1485_v31  ;;  %v1487_v35 = vpop.f32.mrb[5].mxu1 }
 0x35c   :  { %v1488_v36 = vpop.f32.mrb[6].mxu1 }
 0x35d   :  { %v1495_v40 = vrot.slane %v1492_v32, 7  ;;  %v1489_v41 = vpop.f32.mrb[7].mxu1 }
 0x35f   :  { %v1497_v42 = vsel %vm1496_vm1, %v1495_v40, %v1491_v39 }
 0x360   :  { %v1499_v57 = vsel %vm1047_vm0, %v1497_v42, -inf }
 0x361   :  { %1500 = vmax.xlane.f32.xlu0 %v1499_v57 }
 0x3ee   :  { %v1501_v44 = vpop.xlane.xlu0 %1500 }
 0x3ef   :  { %v1503_v16 = vrot.slane %v1501_v44, 1  ;;  %v1506_v38 = vsub.f32 %v1491_v39, %v1501_v44 }
 0x3f1   :  { %v1507_v45 = vsub.f32 %v1492_v32, %v1503_v16  ;;  %v1508_v46 = vmul.f32 1.442695, %v1506_v38 }
 0x3f3   :  { %v1510_v47 = vmul.f32 1.442695, %v1507_v45 }
 0x3f5   :  { %1905 = vpow2.f32 %v1510_v47 }
 0x3f6   :  { %1907 = vpow2.f32 %v1508_v46 }
 0x3ff   :  { %v1906_v48 = vpop.eup %1905 }
 0x400   :  { %v1514_v49 = vrot.slane %v1906_v48, 7  ;;  %v1908_v50 = vpop.eup %1907 }
 0x402   :  { %v1515_v51 = vsel %vm1496_vm1, %v1514_v49, %v1908_v50 }
 0x403   :  { %v1517_v52 = vsel %vm1047_vm0, %v1515_v51, 0.0 }
 0x404   :  { %1518 = vadd.xlane.f32.xlu1 %v1517_v52 }
 0x491   :  { %v1519_v53 = vpop.xlane.xlu1 %1518 }
 0x492   :  { %1909 = vrcp.f32 %v1519_v53 }
 0x49c   :  { %v1910_v54 = vpop.eup %1909 }
 0x49d   :  { %v1522_v55 = vrot.slane %v1910_v54, 1  ;;  %v1525_v58 = vmul.f32 %v1910_v54, %v1908_v50 }
 0x49f   :  { %v1526_v56 = vmul.f32 %v1906_v48, %v1522_v55 }
 0x4a1   :  { %v1529_v43 = vrot.slane %v1526_v56, 7 }
 0x4a3   :  { %v1530_v59 = vsel %vm1496_vm1, %v1529_v43, %v1525_v58 }
 0x4a4   :  { %1532 = vst [vmem:[#allocation8] sm:$0x3] %v1530_v59 }
 0x4a5   :  { %1988 = shalt.err (!%p1985_p0)
}
 0x4a6   :  { %s1989_s6 = scalar_lea.hbm %s2170_s4, 32 }
 0x4a7   :  { %p1990_p1 = scmp.ne.s32.totalorder %s2170_s4, %s1989_s6  ;;  %p1993_p2 = scmp.lt.u32.totalorder %s1989_s6, %s2170_s4 }
 0x4a9   :  { %p1995_p3 = pnand %p1993_p2, %p1990_p1 }
 0x4ab   :  { %1998 = shalt.err (!%p1995_p3)
}
 0x4ac   :  { %1542 = dma.vmem_to_hbm [thread:$0]  %s1540_s28, 32, %s2170_s4, [#allocation4]  }
 0x4ad   :  { %2003 = dma.done.wait [#allocation4], 32  }
 0x4ae   :  { %2004 = vsyncadd [#allocation4], 4294967264 }
 0x4af   :  { %1546 = vsyncpa [#allocation3], 1 }
 0x4b0   :  { %1547 = vsyncpa [#allocation6], 1 }
 0x4b1   :  { %1548 = vsyncpa [#allocation4], 1 }

</bundles_post_ra>
